<compile_context>
chip_gen: v7x
topology: tpu7x:2x2x1
jax: 0.10.0
libtpu: 0.0.40
codegen_flags: <defaults>
</compile_context>

<pallas_src>
import math

import jax
import jax.numpy as jnp
from jax.experimental import pallas as pl
from jax.experimental.pallas import tpu as pltpu


def _round_up(a: int, m: int) -> int:
    return ((a + m - 1) // m) * m


def _drop_path_kernel(scale_ref, x_ref, o_ref):
    """Pure per-row scale multiply.

    scale_ref : VMEM (SUB, 128) f32     -- per-sample scale (mask/keep_prob), lane-replicated
    x_ref     : VMEM (SUB, TN)  x.dtype -- one (batch-tile, feature-tile) block
    o_ref     : VMEM (SUB, TN)  x.dtype
    """
    s = scale_ref[:, 0:1]                         # (SUB, 1) f32, broadcast over lanes
    o_ref[...] = (x_ref[...] * s).astype(o_ref.dtype)


def drop_path_pallas(x, drop_prob: float = 0.0, training: bool = False,
                     *, key=None, seed: int = 0):
    """Pallas DropPath.  Matches torch drop_path() semantics (RNG source differs)."""
    if drop_prob == 0.0 or not training:
        return x

    keep_prob = 1.0 - float(drop_prob)
    B = x.shape[0]
    N = int(math.prod(x.shape[1:]))

    # --- per-sample Bernoulli(keep_prob) -> f32 scale, computed outside the kernel ---
    if key is None:
        key = jax.random.PRNGKey(seed)
    u = jax.random.uniform(key, (B,), dtype=jnp.float32)
    mask = jnp.floor(jnp.float32(keep_prob) + u)            # 0.0 or 1.0 per sample
    scale = mask * jnp.float32(1.0 / keep_prob)             # keep in f32

    # --- tiling ---
    sub = 16 if jnp.dtype(x.dtype).itemsize == 2 else 8     # sublane packing factor
    B_pad = _round_up(B, sub)
    N_pad = _round_up(max(N, 1), 128)                       # lane-dense output
    tn = 128
    for cand in (2048, 1024, 512, 256, 128):                # largest tile that divides N_pad
        if N_pad % cand == 0:
            tn = cand
            break
    # VMEM working set: 2 inputs + 1 output, double-buffered, <= ~3 * 2 * 16 KiB*dtype
    # at tn=2048 -> far under the scoped VMEM limit on v5e/v6e/v7x.

    x2p = jnp.pad(x.reshape(B, N), ((0, B_pad - B), (0, N_pad - N)))
    scale_p = jnp.pad(scale, (0, B_pad - B))
    scale2 = jnp.broadcast_to(scale_p[:, None], (B_pad, 128))

    grid = (B_pad // sub, N_pad // tn)

    # Note: for very small tensors a plain `x * scale` would beat the kernel launch
    # overhead; kept always-on here so the example exercises the Pallas kernel.
    out = pl.pallas_call(
        _drop_path_kernel,
        out_shape=jax.ShapeDtypeStruct((B_pad, N_pad), x.dtype),
        grid=grid,
        in_specs=[
            pl.BlockSpec((sub, 128), lambda i, j: (i, 0)),   # per-sample scale
            pl.BlockSpec((sub, tn), lambda i, j: (i, j)),    # x tile
        ],
        out_specs=pl.BlockSpec((sub, tn), lambda i, j: (i, j)),
        input_output_aliases={1: 0},                         # reuse (padded) x buffer
        compiler_params=pltpu.CompilerParams(
            dimension_semantics=("parallel", "parallel"),
        ),
    )(scale2, x2p)

    return out[:B, :N].reshape(x.shape)


class DropPath:
    """Minimal stand-in for the nn.Module (no parameters)."""

    def __init__(self, drop_prob=None):
        self.drop_prob = 0.0 if drop_prob is None else float(drop_prob)
        self.training = True

    def __call__(self, x, *, key=None, seed: int = 0):
        return drop_path_pallas(x, self.drop_prob, self.training, key=key, seed=seed)


if __name__ == "__main__":
    key = jax.random.PRNGKey(0)
    # Small NCHW input consistent with use inside a CCT block.
    x = jax.random.normal(key, (2, 4, 16, 16), dtype=jnp.float32)

    module = DropPath(drop_prob=0.5)
    module.training = True
    y = jax.block_until_ready(module(x, seed=1234))

    # Sanity: each sample is either all-zeros or exactly x / keep_prob.
    keep_prob = 1.0 - module.drop_prob
    for b in range(x.shape[0]):
        yb = y[b]
        kept = bool(jnp.allclose(yb, x[b] / keep_prob, atol=1e-5))
        dropped = bool(jnp.allclose(yb, 0.0))
        assert kept or dropped, "per-sample mask not binary"

    # Eval mode / drop_prob=0 must be identity (no kernel launch).
    module.training = False
    y_eval = jax.block_until_ready(module(x))
    assert jnp.array_equal(y_eval, x)

    print("KERNEL_OK")
</pallas_src>

<mosaic_0001>
module attributes {stable_mosaic.version = 11 : i64} {
  func.func @_drop_path_kernel(%arg0: i32, %arg1: i32, %arg2: memref<8x128xf32, #tpu.memory_space<vmem>>, %arg3: memref<8x1024xf32, #tpu.memory_space<vmem>>, %arg4: memref<8x1024xf32, #tpu.memory_space<vmem>>) attributes {dimension_semantics = [#tpu.dimension_semantics<parallel>, #tpu.dimension_semantics<parallel>], iteration_bounds = array<i64: 1, 1>, scalar_prefetch = 0 : i64, scratch_operands = 0 : i64, tpu.core_type = #tpu.core_type<tc>, window_params = [{transform_indices = @transform_0, window_bounds = array<i64: 8, 128>}, {transform_indices = @transform_1, window_bounds = array<i64: 8, 1024>}, {transform_indices = @transform_2, window_bounds = array<i64: 8, 1024>}]} {
    %c0 = arith.constant 0 : index
    %c0_0 = arith.constant 0 : index
    %0 = vector.load %arg2[%c0, %c0_0] : memref<8x128xf32, #tpu.memory_space<vmem>>, vector<8x1xf32>
    %c0_1 = arith.constant 0 : index
    %c0_2 = arith.constant 0 : index
    %1 = vector.load %arg3[%c0_1, %c0_2] : memref<8x1024xf32, #tpu.memory_space<vmem>>, vector<8x1024xf32>
    %2 = vector.broadcast %0 : vector<8x1xf32> to vector<8x1024xf32>
    %3 = arith.mulf %1, %2 : vector<8x1024xf32>
    %c0_3 = arith.constant 0 : index
    %c0_4 = arith.constant 0 : index
    %4 = vector.load %arg4[%c0_3, %c0_4] : memref<8x1024xf32, #tpu.memory_space<vmem>>, vector<8x1024xf32>
    tpu.vector_store %arg4[%c0_3, %c0_4], %3 {strides = array<i32>} : memref<8x1024xf32, #tpu.memory_space<vmem>>, vector<8x1024xf32>,
    return
  }
  func.func @transform_0(%arg0: i32, %arg1: i32) -> (i32, i32) {
    %c0_i32 = arith.constant 0 : i32
    %c0_i32_0 = arith.constant 0 : i32
    return %arg0, %c0_i32 : i32, i32
  }
  func.func @transform_1(%arg0: i32, %arg1: i32) -> (i32, i32) {
    %c0_i32 = arith.constant 0 : i32
    return %arg0, %arg1 : i32, i32
  }
  func.func @transform_2(%arg0: i32, %arg1: i32) -> (i32, i32) {
    %c0_i32 = arith.constant 0 : i32
    return %arg0, %arg1 : i32, i32
  }
}

</mosaic_0001>

<bundles_post_ra>
// kernel: tpu_custom_call.1
= control target key start
LH: loop header
LB: loop body
LE: loop exit
PB: predicated region body
PF: predicated region fallthrough
CT: control target
= control target key end

     0   :  { %7 = vsyncpa [#allocation3], 0  ;;  %s166_s0 = inlined_call_operand.vmem [shape: f32[8,128], index: 0, kind: input, shape index: {}]   ;;  %s167_s1 = inlined_call_operand.hbm [shape: f32[8,1024], index: 1, kind: input, shape index: {}, may-alias: {1,2}]   ;;  %s168_s2 = inlined_call_operand.hbm [shape: f32[8,1024], index: 2, kind: output, shape index: {}, may-alias: {1,2}]  }
   0x1   :  { %8 = vsyncpa [#allocation4], 0  ;;  %s121_s9 = smov [#allocation2]   ;;  %s73_s13 = scalar_lea.hbm %s167_s1, 1024 }
   0x2   :  { %s17_s10 = sshll.u32 %s121_s9, 4  ;;  %p74_p0 = scmp.ne.s32.totalorder %s167_s1, %s73_s13  ;;  %s18_s10 = int_to_ptr.vmem [resolvable:$true] %s17_s10 }
   0x3   :  { %p77_p1 = scmp.lt.u32.totalorder %s73_s13, %s167_s1 }
   0x5   :  { %p79_p2 = pnand %p77_p1, %p74_p0 }
   0x7   :  { %82 = shalt.err (!%p79_p2)
}
   0x8   :  { %s83_s18 = scalar_lea.vmem %s18_s10, 1024  ;;  %p88_p4 = scmp.lt.s32.totalorder %s18_s10, %s18_s10 }
   0x9   :  { %p84_p3 = scmp.ne.s32.totalorder %s18_s10, %s83_s18  ;;  %p89_p5 = scmp.lt.s32.totalorder %s83_s18, %s83_s18 }
   0xb   :  { %p90_p6 = por %p89_p5, %p88_p4 }
   0xd   :  { %p91_p7 = pnand %p90_p6, %p84_p3 }
   0xf   :  { %94 = shalt.err (!%p91_p7)
}
  0x10   :  { %20 = dma.hbm_to_vmem [thread:$0]  %s167_s1, 1024, %s18_s10, [#allocation3]  }
  0x11   :  { %117 = dma.done.wait [#allocation3], 1024  }
  0x12   :  { %118 = vsyncadd [#allocation3], 4294966272  ;;  %v122_v0 = vmov 0   ;;  %v24_v1 = vld [vmem:[%s166_s0] sm:$0xff]  ;;  %v26_v3 = vld [vmem:[#allocation2 + $0x8] sm:$0xff]  ;;  %s123_s23 = smov [#allocation5]  }
  0x13   :  { %72 = vset.pattern.permute.xlu0 %v122_v0  ;;  %v25_v2 = vld [vmem:[#allocation2] sm:$0xff]  ;;  %v27_v4 = vld [vmem:[#allocation2 + $0x10] sm:$0xff]  ;;  %v28_v5 = vld [vmem:[#allocation2 + $0x18] sm:$0xff]  ;;  %s60_s24 = sshll.u32 %s123_s23, 4  ;;  %s61_s24 = int_to_ptr.vmem [resolvable:$true] %s60_s24 }
  0x14   :  { %35 = vperm.xlu0 %72, %v24_v1   ;;  %v29_v6 = vld [vmem:[#allocation2 + $0x20] sm:$0xff]  ;;  %v30_v7 = vld [vmem:[#allocation2 + $0x28] sm:$0xff]  ;;  %v31_v8 = vld [vmem:[#allocation2 + $0x30] sm:$0xff]  ;;  %s95_s0 = scalar_lea.vmem %s61_s24, 1024  ;;  %p100_p9 = scmp.lt.s32.totalorder %s61_s24, %s61_s24 }
  0x15   :  { %v32_v9 = vld [vmem:[#allocation2 + $0x38] sm:$0xff]  ;;  %p96_p8 = scmp.ne.s32.totalorder %s61_s24, %s95_s0  ;;  %p101_p10 = scmp.lt.s32.totalorder %s95_s0, %s95_s0 }
  0x17   :  { %p102_p11 = por %p101_p10, %p100_p9 }
  0x19   :  { %p103_p12 = pnand %p102_p11, %p96_p8 }
  0x93   :  { %v36_v10 = vpop.permute.xlu0 %35 }
  0x94   :  { %v38_v11 = vmul.f32 %v36_v10, %v25_v2  ;;  %v39_v12 = vmul.f32 %v36_v10, %v26_v3  ;;  %v40_v13 = vmul.f32 %v36_v10, %v27_v4  ;;  %v41_v14 = vmul.f32 %v36_v10, %v28_v5 }
  0x95   :  { %v42_v15 = vmul.f32 %v36_v10, %v29_v6  ;;  %v43_v16 = vmul.f32 %v36_v10, %v30_v7  ;;  %v44_v17 = vmul.f32 %v36_v10, %v31_v8  ;;  %v45_v18 = vmul.f32 %v36_v10, %v32_v9 }
  0x96   :  { %46 = vst [vmem:[#allocation5] sm:$0xff] %v38_v11  ;;  %47 = vst [vmem:[#allocation5 + $0x8] sm:$0xff] %v39_v12 }
  0x97   :  { %48 = vst [vmem:[#allocation5 + $0x10] sm:$0xff] %v40_v13  ;;  %49 = vst [vmem:[#allocation5 + $0x18] sm:$0xff] %v41_v14 }
  0x98   :  { %50 = vst [vmem:[#allocation5 + $0x20] sm:$0xff] %v42_v15  ;;  %51 = vst [vmem:[#allocation5 + $0x28] sm:$0xff] %v43_v16 }
  0x99   :  { %52 = vst [vmem:[#allocation5 + $0x30] sm:$0xff] %v44_v17  ;;  %53 = vst [vmem:[#allocation5 + $0x38] sm:$0xff] %v45_v18 }
  0x9a   :  { %106 = shalt.err (!%p103_p12)
}
  0x9b   :  { %s107_s26 = scalar_lea.hbm %s168_s2, 1024 }
  0x9c   :  { %p108_p13 = scmp.ne.s32.totalorder %s168_s2, %s107_s26  ;;  %p111_p0 = scmp.lt.u32.totalorder %s107_s26, %s168_s2 }
  0x9e   :  { %p113_p1 = pnand %p111_p0, %p108_p13 }
  0xa0   :  { %116 = shalt.err (!%p113_p1)
}
  0xa1   :  { %63 = dma.vmem_to_hbm [thread:$0]  %s61_s24, 1024, %s168_s2, [#allocation4]  }
  0xa2   :  { %119 = dma.done.wait [#allocation4], 1024  }
  0xa3   :  { %120 = vsyncadd [#allocation4], 4294966272 }
  0xa4   :  { %67 = vsyncpa [#allocation3], 1 }
  0xa5   :  { %68 = vsyncpa [#allocation4], 1 }

</bundles_post_ra>
